<compile_context>
chip_gen: v6e
topology: v6e:2x2x1
jax: 0.10.0
libtpu: 0.0.40
codegen_flags: <defaults>
</compile_context>

<pallas_src>
import functools

import jax
import jax.numpy as jnp
from jax.experimental import pallas as pl
from jax.experimental.pallas import tpu as pltpu


def _bottleneck_kernel(*refs, H, W, has_downsample):
    """Fused Bottleneck forward for one image (channel-major layout).

    Ref shapes (per grid step, spatial flattened to HW = H*W):
      x_ref    : (1, C_in, HW)     bf16
      w1_ref   : (C1, C_in)        bf16   (BN1 scale folded in)
      b1_ref   : (C1, 1)           f32
      w2g_ref  : (3, C2, 3*C1)     bf16   (dx-grouped; K axis = (dy, C1))
      b2_ref   : (C2, 1)           f32
      w3_ref   : (C3, C2)          bf16   (BN3 scale folded in)
      b3_ref   : (C3, 1)           f32
      [wd_ref  : (C3, C_in) bf16, bd_ref: (C3, 1) f32]   (downsample, optional)
      o_ref    : (1, C3, HW)       out dtype
      h1pad_ref: (3*C1, HW + 2*W)  bf16 scratch
                 row group g holds conv1 output shifted by dy = g-1, written at
                 column offset (2-g)*W; interior (read) window is [W, W+HW).
    """
    if has_downsample:
        (x_ref, w1_ref, b1_ref, w2g_ref, b2_ref, w3_ref, b3_ref,
         wd_ref, bd_ref, o_ref, h1pad_ref) = refs
    else:
        (x_ref, w1_ref, b1_ref, w2g_ref, b2_ref, w3_ref, b3_ref,
         o_ref, h1pad_ref) = refs
        wd_ref = bd_ref = None

    HW = H * W
    C1 = w1_ref.shape[0]

    x = x_ref[0]                                           # (C_in, HW) bf16

    # ---- conv1 (1x1) + bn1 + relu -----------------------------------------
    h1 = jnp.dot(w1_ref[...], x, preferred_element_type=jnp.float32)
    h1 = jnp.maximum(h1 + b1_ref[...], 0.0)                # (C1, HW) f32
    h1b = h1.astype(jnp.bfloat16)                          # single cast

    # ---- stage dy-shifted slabs into the bf16 haloed scratch ---------------
    # Zero only the small left/right bands (halo + vertical padding); the
    # interior is fully overwritten below.  Done every step -> megacore-safe.
    band = jnp.zeros((3 * C1, 2 * W), jnp.bfloat16)
    h1pad_ref[:, 0:2 * W] = band
    h1pad_ref[:, HW:HW + 2 * W] = band

    h1pad_ref[0 * C1:1 * C1, 2 * W:2 * W + HW] = h1b       # group 0: dy = -1
    h1pad_ref[1 * C1:2 * C1, W:W + HW] = h1b               # group 1: dy =  0
    h1pad_ref[2 * C1:3 * C1, 0:HW] = h1b                   # group 2: dy = +1

    # Column masks cancelling horizontal wrap-around of the flattened axis.
    col = jax.lax.broadcasted_iota(jnp.int32, (1, HW), 1) % W
    mask_l = (col != 0).astype(jnp.float32)         # x-1 invalid at x == 0
    mask_r = (col != (W - 1)).astype(jnp.float32)   # x+1 invalid at x == W-1

    # ---- conv2 (3x3, pad=1, stride=1) + bn2 + relu --------------------------
    # One matmul per dx group with K = 3*C1 (all three dy taps fused).
    def dx_group(g):                       # g: 0 -> dx=-1, 1 -> dx=0, 2 -> dx=+1
        start = (W - 1) + g                # static offsets
        slab = h1pad_ref[:, start:start + HW]               # (3*C1, HW) bf16
        return jnp.dot(w2g_ref[g], slab,
                       preferred_element_type=jnp.float32)  # (C2, HW) f32

    acc2 = dx_group(1) + dx_group(0) * mask_l + dx_group(2) * mask_r
    h2 = jnp.maximum(acc2 + b2_ref[...], 0.0)               # (C2, HW) f32

    # ---- conv3 (1x1) + bn3 --------------------------------------------------
    out = jnp.dot(w3_ref[...], h2.astype(jnp.bfloat16),
                  preferred_element_type=jnp.float32) + b3_ref[...]   # (C3, HW)

    # ---- residual + relu ----------------------------------------------------
    if has_downsample:
        out = out + (jnp.dot(wd_ref[...], x, preferred_element_type=jnp.float32)
                     + bd_ref[...])
    else:
        out = out + x          # bf16 residual promotes elementwise; no f32 temp
    o_ref[0] = jnp.maximum(out, 0.0).astype(o_ref.dtype)


def bottleneck_forward(x, params, *, stride=1, out_dtype=jnp.float32):
    """Forward pass of `Bottleneck` (inference-mode BN), x in NCHW f32.

    Returns (N, planes*4, H, W) in `out_dtype` (f32 default, bf16 optional).
    """
    if stride != 1:
        # TODO(synk): stride > 1 needs a strided 3x3 conv + strided downsample.
        raise NotImplementedError("stride != 1 is not implemented")

    n, c_in, h, w = x.shape
    assert h >= 2 and w >= 2
    hw = h * w
    has_downsample = "wd" in params
    c1 = params["w1"].shape[0]
    c2 = params["b2"].shape[0]
    c3 = params["w3"].shape[0]

    # Free reshape only (NCHW kept; spatial flattened onto the lane axis),
    # bf16 cast halves the dominant HBM read stream.
    xb = x.astype(jnp.bfloat16).reshape(n, c_in, hw)

    kernel_keys = ["w1", "b1", "w2g", "b2", "w3", "b3"]
    if has_downsample:
        kernel_keys += ["wd", "bd"]
    weights = [params[k] for k in kernel_keys]

    inputs = [xb] + weights
    in_specs = [pl.BlockSpec((1, c_in, hw), lambda i: (i, 0, 0))]
    for wgt in weights:
        in_specs.append(pl.BlockSpec(wgt.shape, lambda i, nd=wgt.ndim: (0,) * nd))

    out_itemsize = jnp.dtype(out_dtype).itemsize
    weight_bytes = sum(int(v.size) * v.dtype.itemsize for v in weights)
    scratch_bytes = 3 * c1 * (hw + 2 * w) * 2
    temp_bytes = (c1 + 3 * c2 + 2 * c3 + c_in) * hw * 4
    est = (2 * c_in * hw * 2 + 2 * c3 * hw * out_itemsize
           + 2 * weight_bytes + scratch_bytes + temp_bytes)
    vmem_limit = int(min(64 * 1024 * 1024, max(32 * 1024 * 1024, 2 * est)))

    flops = 2 * n * hw * (c1 * c_in + 9 * c2 * c1 + c3 * c2
                          + (c3 * c_in if has_downsample else 0))
    bytes_accessed = int(n * c_in * hw * 2 + n * c3 * hw * out_itemsize
                         + weight_bytes)

    kernel = functools.partial(_bottleneck_kernel, H=h, W=w,
                               has_downsample=has_downsample)

    y = pl.pallas_call(
        kernel,
        out_shape=jax.ShapeDtypeStruct((n, c3, hw), out_dtype),
        grid_spec=pltpu.PrefetchScalarGridSpec(
            num_scalar_prefetch=0,
            grid=(n,),
            in_specs=in_specs,
            out_specs=pl.BlockSpec((1, c3, hw), lambda i: (i, 0, 0)),
            scratch_shapes=[pltpu.VMEM((3 * c1, hw + 2 * w), jnp.bfloat16)],
        ),
        compiler_params=pltpu.CompilerParams(
            dimension_semantics=("parallel",),
            vmem_limit_bytes=vmem_limit),
        cost_estimate=pl.CostEstimate(flops=flops, transcendentals=0,
                                      bytes_accessed=bytes_accessed),
    )(*inputs)
    return y.reshape(n, c3, h, w)


# ---------------------------------------------------------------------------
# Parameter preparation (fold inference-mode BatchNorm into the convs)
# ---------------------------------------------------------------------------
def _fold_bn(conv_w, gamma, beta, mean, var, eps=1e-5):
    scale = gamma / jnp.sqrt(var + eps)
    w = conv_w * scale.reshape(-1, *([1] * (conv_w.ndim - 1)))
    b = beta - mean * scale
    return w, b


def prepare_params(tp):
    """tp holds torch-shaped tensors: conv*_w (Cout,Cin,kh,kw), bn* = (g,b,m,v)."""
    w1, b1 = _fold_bn(tp["conv1_w"], *tp["bn1"])
    w2, b2 = _fold_bn(tp["conv2_w"], *tp["bn2"])
    w3, b3 = _fold_bn(tp["conv3_w"], *tp["bn3"])
    c2, c1 = w2.shape[:2]
    p = {
        "w1": w1[:, :, 0, 0].astype(jnp.bfloat16),
        "b1": b1.reshape(-1, 1).astype(jnp.float32),
        # dx-grouped im2col weights: w2g[dx, o, dy*C1 + c] = w2[o, c, dy, dx]
        "w2g": jnp.transpose(w2, (3, 0, 2, 1)).reshape(3, c2, 3 * c1).astype(jnp.bfloat16),
        # per-tap copy, used only by the pure-JAX reference
        "w2k": jnp.transpose(w2, (2, 3, 0, 1)).reshape(9, c2, c1).astype(jnp.bfloat16),
        "b2": b2.reshape(-1, 1).astype(jnp.float32),
        "w3": w3[:, :, 0, 0].astype(jnp.bfloat16),
        "b3": b3.reshape(-1, 1).astype(jnp.float32),
    }
    if "down_conv_w" in tp:
        wd, bd = _fold_bn(tp["down_conv_w"], *tp["bn_d"])
        p["wd"] = wd[:, :, 0, 0].astype(jnp.bfloat16)
        p["bd"] = bd.reshape(-1, 1).astype(jnp.float32)
    return p


# ---------------------------------------------------------------------------
# Pure-JAX reference (mirrors the kernel numerics: bf16 operands, f32 accum)
# ---------------------------------------------------------------------------
def reference_forward(x, params, *, has_downsample):
    n, c_in, h, w = x.shape
    xb = x.astype(jnp.bfloat16)

    def pconv(wmat, inp):   # 1x1 conv == channel matmul
        return jnp.einsum("oc,nchw->nohw", wmat, inp,
                          preferred_element_type=jnp.float32)

    h1 = pconv(params["w1"], xb) + params["b1"].reshape(1, -1, 1, 1)
    h1 = jnp.maximum(h1, 0.0).astype(jnp.bfloat16)
    h1p = jnp.pad(h1, ((0, 0), (0, 0), (1, 1), (1, 1)))
    acc = jnp.zeros((n, params["b2"].shape[0], h, w), jnp.float32)
    k = 0
    for dy in range(3):
        for dx in range(3):
            acc = acc + jnp.einsum(
                "oc,nchw->nohw", params["w2k"][k],
                h1p[:, :, dy:dy + h, dx:dx + w],
                preferred_element_type=jnp.float32)
            k += 1
    h2 = jnp.maximum(acc + params["b2"].reshape(1, -1, 1, 1), 0.0)
    out = (pconv(params["w3"], h2.astype(jnp.bfloat16))
           + params["b3"].reshape(1, -1, 1, 1))
    if has_downsample:
        res = pconv(params["wd"], xb) + params["bd"].reshape(1, -1, 1, 1)
    else:
        res = xb.astype(jnp.float32)
    return jnp.maximum(out + res, 0.0)


if __name__ == "__main__":
    # Small shapes consistent with the module: inplanes=64, planes=16
    # (so planes*4 == inplanes and the identity residual is valid), 16x16 maps.
    N, C_IN, PLANES, H, W = 2, 64, 16, 16, 16
    C1 = C2 = PLANES
    C3 = PLANES * 4

    key = jax.random.PRNGKey(0)
    keys = jax.random.split(key, 9)

    def bn_params(k, c):
        kg, kb, km, kv = jax.random.split(k, 4)
        return (jax.random.uniform(kg, (c,), jnp.float32, 0.5, 1.5),   # gamma
                jax.random.uniform(kb, (c,), jnp.float32, -0.5, 0.5),  # beta
                jax.random.normal(km, (c,), jnp.float32) * 0.1,        # mean
                jax.random.uniform(kv, (c,), jnp.float32, 0.5, 1.5))   # var

    torch_params = {
        "conv1_w": jax.random.normal(keys[0], (C1, C_IN, 1, 1), jnp.float32) * 0.1,
        "bn1": bn_params(keys[1], C1),
        "conv2_w": jax.random.normal(keys[2], (C2, C1, 3, 3), jnp.float32) * 0.1,
        "bn2": bn_params(keys[3], C2),
        "conv3_w": jax.random.normal(keys[4], (C3, C2, 1, 1), jnp.float32) * 0.1,
        "bn3": bn_params(keys[5], C3),
    }
    torch_params_ds = dict(torch_params)
    torch_params_ds["down_conv_w"] = (
        jax.random.normal(keys[6], (C3, C_IN, 1, 1), jnp.float32) * 0.1)
    torch_params_ds["bn_d"] = bn_params(keys[7], C3)

    x = jax.random.normal(keys[8], (N, C_IN, H, W), jnp.float32)

    for tp in (torch_params, torch_params_ds):        # without / with downsample
        params = prepare_params(tp)
        has_ds = "wd" in params
        y = jax.block_until_ready(bottleneck_forward(x, params))
        ref = reference_forward(x, params, has_downsample=has_ds)
        assert y.shape == (N, C3, H, W), y.shape
        err = float(jnp.max(jnp.abs(y - ref)))
        assert err < 2e-3, f"max abs err {err} (downsample={has_ds})"

    print("KERNEL_OK")
</pallas_src>

<mosaic_0001>
module attributes {stable_mosaic.version = 11 : i64} {
  func.func @_bottleneck_kernel(%arg0: i32, %arg1: memref<1x64x256xbf16, #tpu.memory_space<vmem>>, %arg2: memref<16x64xbf16, #tpu.memory_space<vmem>>, %arg3: memref<16x1xf32, #tpu.memory_space<vmem>>, %arg4: memref<3x16x48xbf16, #tpu.memory_space<vmem>>, %arg5: memref<16x1xf32, #tpu.memory_space<vmem>>, %arg6: memref<64x16xbf16, #tpu.memory_space<vmem>>, %arg7: memref<64x1xf32, #tpu.memory_space<vmem>>, %arg8: memref<1x64x256xf32, #tpu.memory_space<vmem>>, %arg9: memref<48x288xbf16, #tpu.memory_space<vmem>>) attributes {dimension_semantics = [#tpu.dimension_semantics<parallel>], iteration_bounds = array<i64: 2>, scalar_prefetch = 0 : i64, scratch_operands = 1 : i64, tpu.core_type = #tpu.core_type<tc>, window_params = [{transform_indices = @transform_0, window_bounds = array<i64: 1, 64, 256>}, {pipeline_mode = #tpu.pipeline_mode<synchronous>, transform_indices = @transform_1, window_bounds = array<i64: 16, 64>}, {pipeline_mode = #tpu.pipeline_mode<synchronous>, transform_indices = @transform_2, window_bounds = array<i64: 16, 1>}, {pipeline_mode = #tpu.pipeline_mode<synchronous>, transform_indices = @transform_3, window_bounds = array<i64: 3, 16, 48>}, {pipeline_mode = #tpu.pipeline_mode<synchronous>, transform_indices = @transform_4, window_bounds = array<i64: 16, 1>}, {pipeline_mode = #tpu.pipeline_mode<synchronous>, transform_indices = @transform_5, window_bounds = array<i64: 64, 16>}, {pipeline_mode = #tpu.pipeline_mode<synchronous>, transform_indices = @transform_6, window_bounds = array<i64: 64, 1>}, {transform_indices = @transform_7, window_bounds = array<i64: 1, 64, 256>}]} {
    %c0 = arith.constant 0 : index
    %c0_0 = arith.constant 0 : index
    %c0_1 = arith.constant 0 : index
    %0 = vector.load %arg1[%c0, %c0_0, %c0_1] : memref<1x64x256xbf16, #tpu.memory_space<vmem>>, vector<1x64x256xbf16>
    %1 = vector.shape_cast %0 : vector<1x64x256xbf16> to vector<64x256xbf16>
    %c0_2 = arith.constant 0 : index
    %c0_3 = arith.constant 0 : index
    %2 = vector.load %arg2[%c0_2, %c0_3] : memref<16x64xbf16, #tpu.memory_space<vmem>>, vector<16x64xbf16>
    %cst = arith.constant dense<0.000000e+00> : vector<16x256xf32>
    %3 = tpu.matmul %2, %1, %cst {dimension_numbers = #tpu.dot_dimension_numbers<[1], [0], [0], [1], [0, 0, 1, 1], [], []>} : vector<16x64xbf16>, vector<64x256xbf16>, vector<16x256xf32> -> vector<16x256xf32>
    %c0_4 = arith.constant 0 : index
    %c0_5 = arith.constant 0 : index
    %4 = vector.load %arg3[%c0_4, %c0_5] : memref<16x1xf32, #tpu.memory_space<vmem>>, vector<16x1xf32>
    %5 = vector.broadcast %4 : vector<16x1xf32> to vector<16x256xf32>
    %6 = arith.addf %3, %5 : vector<16x256xf32>
    %cst_6 = arith.constant 0.000000e+00 : f32
    %7 = vector.broadcast %cst_6 : f32 to vector<16x256xf32>
    %8 = arith.maximumf %6, %7 : vector<16x256xf32>
    %9 = arith.truncf %8 : vector<16x256xf32> to vector<16x256xbf16>
    %cst_7 = arith.constant 0.000000e+00 : bf16
    %10 = vector.broadcast %cst_7 : bf16 to vector<48x32xbf16>
    %c0_8 = arith.constant 0 : index
    %c0_9 = arith.constant 0 : index
    %11 = vector.load %arg9[%c0_8, %c0_9] : memref<48x288xbf16, #tpu.memory_space<vmem>>, vector<48x32xbf16>
    tpu.vector_store %arg9[%c0_8, %c0_9], %10 {strides = array<i32>} : memref<48x288xbf16, #tpu.memory_space<vmem>>, vector<48x32xbf16>,
    %c0_10 = arith.constant 0 : index
    %c256 = arith.constant 256 : index
    %12 = vector.load %arg9[%c0_10, %c256] : memref<48x288xbf16, #tpu.memory_space<vmem>>, vector<48x32xbf16>
    tpu.vector_store %arg9[%c0_10, %c256], %10 {strides = array<i32>} : memref<48x288xbf16, #tpu.memory_space<vmem>>, vector<48x32xbf16>,
    %c0_11 = arith.constant 0 : index
    %c32 = arith.constant 32 : index
    %13 = vector.load %arg9[%c0_11, %c32] : memref<48x288xbf16, #tpu.memory_space<vmem>>, vector<16x256xbf16>
    tpu.vector_store %arg9[%c0_11, %c32], %9 {strides = array<i32>} : memref<48x288xbf16, #tpu.memory_space<vmem>>, vector<16x256xbf16>,
    %c16 = arith.constant 16 : index
    %c16_12 = arith.constant 16 : index
    %14 = vector.load %arg9[%c16, %c16_12] : memref<48x288xbf16, #tpu.memory_space<vmem>>, vector<16x256xbf16>
    tpu.vector_store %arg9[%c16, %c16_12], %9 {strides = array<i32>} : memref<48x288xbf16, #tpu.memory_space<vmem>>, vector<16x256xbf16>,
    %c32_13 = arith.constant 32 : index
    %c0_14 = arith.constant 0 : index
    %15 = vector.load %arg9[%c32_13, %c0_14] : memref<48x288xbf16, #tpu.memory_space<vmem>>, vector<16x256xbf16>
    tpu.vector_store %arg9[%c32_13, %c0_14], %9 {strides = array<i32>} : memref<48x288xbf16, #tpu.memory_space<vmem>>, vector<16x256xbf16>,
    %16 = tpu.iota {dimensions = array<i32: 1>} : vector<1x256xi32>
    %c16_i32 = arith.constant 16 : i32
    %c0_i32 = arith.constant 0 : i32
    %17 = arith.cmpi eq, %c16_i32, %c0_i32 : i32
    %c1_i32 = arith.constant 1 : i32
    %18 = arith.select %17, %c1_i32, %c16_i32 : i32
    %19 = vector.broadcast %18 : i32 to vector<1x256xi32>
    %20 = arith.remsi %16, %19 : vector<1x256xi32>
    %c0_i32_15 = arith.constant 0 : i32
    %21 = vector.broadcast %c0_i32_15 : i32 to vector<1x256xi32>
    %22 = arith.cmpi ne, %20, %21 : vector<1x256xi32>
    %c0_i32_16 = arith.constant 0 : i32
    %23 = vector.broadcast %c0_i32_16 : i32 to vector<1x256xi32>
    %24 = arith.cmpi slt, %20, %23 : vector<1x256xi32>
    %c0_i32_17 = arith.constant 0 : i32
    %25 = arith.cmpi slt, %18, %c0_i32_17 : i32
    %26 = vector.broadcast %25 : i1 to vector<1x256xi1>
    %27 = vector.broadcast %26 : vector<1x256xi1> to vector<1x256xi1>
    %28 = arith.xori %24, %27 : vector<1x256xi1>
    %29 = arith.andi %28, %22 : vector<1x256xi1>
    %30 = vector.broadcast %18 : i32 to vector<1x256xi32>
    %31 = arith.addi %20, %30 : vector<1x256xi32>
    %32 = arith.select %29, %31, %20 : vector<1x256xi1>, vector<1x256xi32>
    %c0_i32_18 = arith.constant 0 : i32
    %33 = vector.broadcast %c0_i32_18 : i32 to vector<1x256xi32>
    %34 = arith.cmpi ne, %32, %33 : vector<1x256xi32>
    %35 = arith.extui %34 : vector<1x256xi1> to vector<1x256xi32>
    %36 = arith.sitofp %35 : vector<1x256xi32> to vector<1x256xf32>
    %c15_i32 = arith.constant 15 : i32
    %37 = vector.broadcast %c15_i32 : i32 to vector<1x256xi32>
    %38 = arith.cmpi ne, %32, %37 : vector<1x256xi32>
    %39 = arith.extui %38 : vector<1x256xi1> to vector<1x256xi32>
    %40 = arith.sitofp %39 : vector<1x256xi32> to vector<1x256xf32>
    %c0_19 = arith.constant 0 : index
    %c16_20 = arith.constant 16 : index
    %41 = vector.load %arg9[%c0_19, %c16_20] : memref<48x288xbf16, #tpu.memory_space<vmem>>, vector<48x256xbf16>
    %c1 = arith.constant 1 : index
    %c0_21 = arith.constant 0 : index
    %c0_22 = arith.constant 0 : index
    %42 = vector.load %arg4[%c1, %c0_21, %c0_22] : memref<3x16x48xbf16, #tpu.memory_space<vmem>>, vector<1x16x48xbf16>
    %43 = vector.shape_cast %42 : vector<1x16x48xbf16> to vector<16x48xbf16>
    %cst_23 = arith.constant dense<0.000000e+00> : vector<16x256xf32>
    %44 = tpu.matmul %43, %41, %cst_23 {dimension_numbers = #tpu.dot_dimension_numbers<[1], [0], [0], [1], [0, 0, 1, 1], [], []>} : vector<16x48xbf16>, vector<48x256xbf16>, vector<16x256xf32> -> vector<16x256xf32>
    %c0_24 = arith.constant 0 : index
    %c15 = arith.constant 15 : index
    %45 = vector.load %arg9[%c0_24, %c15] : memref<48x288xbf16, #tpu.memory_space<vmem>>, vector<48x256xbf16>
    %c0_25 = arith.constant 0 : index
    %c0_26 = arith.constant 0 : index
    %c0_27 = arith.constant 0 : index
    %46 = vector.load %arg4[%c0_25, %c0_26, %c0_27] : memref<3x16x48xbf16, #tpu.memory_space<vmem>>, vector<1x16x48xbf16>
    %47 = vector.shape_cast %46 : vector<1x16x48xbf16> to vector<16x48xbf16>
    %cst_28 = arith.constant dense<0.000000e+00> : vector<16x256xf32>
    %48 = tpu.matmul %47, %45, %cst_28 {dimension_numbers = #tpu.dot_dimension_numbers<[1], [0], [0], [1], [0, 0, 1, 1], [], []>} : vector<16x48xbf16>, vector<48x256xbf16>, vector<16x256xf32> -> vector<16x256xf32>
    %49 = vector.broadcast %36 : vector<1x256xf32> to vector<16x256xf32>
    %50 = arith.mulf %48, %49 : vector<16x256xf32>
    %51 = arith.addf %44, %50 : vector<16x256xf32>
    %c0_29 = arith.constant 0 : index
    %c17 = arith.constant 17 : index
    %52 = vector.load %arg9[%c0_29, %c17] : memref<48x288xbf16, #tpu.memory_space<vmem>>, vector<48x256xbf16>
    %c2 = arith.constant 2 : index
    %c0_30 = arith.constant 0 : index
    %c0_31 = arith.constant 0 : index
    %53 = vector.load %arg4[%c2, %c0_30, %c0_31] : memref<3x16x48xbf16, #tpu.memory_space<vmem>>, vector<1x16x48xbf16>
    %54 = vector.shape_cast %53 : vector<1x16x48xbf16> to vector<16x48xbf16>
    %cst_32 = arith.constant dense<0.000000e+00> : vector<16x256xf32>
    %55 = tpu.matmul %54, %52, %cst_32 {dimension_numbers = #tpu.dot_dimension_numbers<[1], [0], [0], [1], [0, 0, 1, 1], [], []>} : vector<16x48xbf16>, vector<48x256xbf16>, vector<16x256xf32> -> vector<16x256xf32>
    %56 = vector.broadcast %40 : vector<1x256xf32> to vector<16x256xf32>
    %57 = arith.mulf %55, %56 : vector<16x256xf32>
    %58 = arith.addf %51, %57 : vector<16x256xf32>
    %c0_33 = arith.constant 0 : index
    %c0_34 = arith.constant 0 : index
    %59 = vector.load %arg5[%c0_33, %c0_34] : memref<16x1xf32, #tpu.memory_space<vmem>>, vector<16x1xf32>
    %60 = vector.broadcast %59 : vector<16x1xf32> to vector<16x256xf32>
    %61 = arith.addf %58, %60 : vector<16x256xf32>
    %cst_35 = arith.constant 0.000000e+00 : f32
    %62 = vector.broadcast %cst_35 : f32 to vector<16x256xf32>
    %63 = arith.maximumf %61, %62 : vector<16x256xf32>
    %c0_36 = arith.constant 0 : index
    %c0_37 = arith.constant 0 : index
    %64 = vector.load %arg6[%c0_36, %c0_37] : memref<64x16xbf16, #tpu.memory_space<vmem>>, vector<64x16xbf16>
    %65 = arith.truncf %63 : vector<16x256xf32> to vector<16x256xbf16>
    %cst_38 = arith.constant dense<0.000000e+00> : vector<64x256xf32>
    %66 = tpu.matmul %64, %65, %cst_38 {dimension_numbers = #tpu.dot_dimension_numbers<[1], [0], [0], [1], [0, 0, 1, 1], [], []>} : vector<64x16xbf16>, vector<16x256xbf16>, vector<64x256xf32> -> vector<64x256xf32>
    %c0_39 = arith.constant 0 : index
    %c0_40 = arith.constant 0 : index
    %67 = vector.load %arg7[%c0_39, %c0_40] : memref<64x1xf32, #tpu.memory_space<vmem>>, vector<64x1xf32>
    %68 = vector.broadcast %67 : vector<64x1xf32> to vector<64x256xf32>
    %69 = arith.addf %66, %68 : vector<64x256xf32>
    %70 = arith.extf %1 : vector<64x256xbf16> to vector<64x256xf32>
    %71 = arith.addf %69, %70 : vector<64x256xf32>
    %cst_41 = arith.constant 0.000000e+00 : f32
    %72 = vector.broadcast %cst_41 : f32 to vector<64x256xf32>
    %73 = arith.maximumf %71, %72 : vector<64x256xf32>
    %c0_42 = arith.constant 0 : index
    %c0_43 = arith.constant 0 : index
    %c0_44 = arith.constant 0 : index
    %74 = vector.load %arg8[%c0_42, %c0_43, %c0_44] : memref<1x64x256xf32, #tpu.memory_space<vmem>>, vector<1x64x256xf32>
    %75 = vector.shape_cast %74 : vector<1x64x256xf32> to vector<64x256xf32>
    %76 = vector.shape_cast %73 : vector<64x256xf32> to vector<1x64x256xf32>
    tpu.vector_store %arg8[%c0_42, %c0_43, %c0_44], %76 {strides = array<i32>} : memref<1x64x256xf32, #tpu.memory_space<vmem>>, vector<1x64x256xf32>,
    return
  }
  func.func @transform_0(%arg0: i32) -> (i32, i32, i32) {
    %c0_i32 = arith.constant 0 : i32
    %c0_i32_0 = arith.constant 0 : i32
    %c0_i32_1 = arith.constant 0 : i32
    return %arg0, %c0_i32, %c0_i32_0 : i32, i32, i32
  }
  func.func @transform_1(%arg0: i32) -> (i32, i32) {
    %c0_i32 = arith.constant 0 : i32
    %c0_i32_0 = arith.constant 0 : i32
    %c0_i32_1 = arith.constant 0 : i32
    return %c0_i32, %c0_i32_0 : i32, i32
  }
  func.func @transform_2(%arg0: i32) -> (i32, i32) {
    %c0_i32 = arith.constant 0 : i32
    %c0_i32_0 = arith.constant 0 : i32
    %c0_i32_1 = arith.constant 0 : i32
    return %c0_i32, %c0_i32_0 : i32, i32
  }
  func.func @transform_3(%arg0: i32) -> (i32, i32, i32) {
    %c0_i32 = arith.constant 0 : i32
    %c0_i32_0 = arith.constant 0 : i32
    %c0_i32_1 = arith.constant 0 : i32
    %c0_i32_2 = arith.constant 0 : i32
    return %c0_i32, %c0_i32_0, %c0_i32_1 : i32, i32, i32
  }
  func.func @transform_4(%arg0: i32) -> (i32, i32) {
    %c0_i32 = arith.constant 0 : i32
    %c0_i32_0 = arith.constant 0 : i32
    %c0_i32_1 = arith.constant 0 : i32
    return %c0_i32, %c0_i32_0 : i32, i32
  }
  func.func @transform_5(%arg0: i32) -> (i32, i32) {
    %c0_i32 = arith.constant 0 : i32
    %c0_i32_0 = arith.constant 0 : i32
    %c0_i32_1 = arith.constant 0 : i32
    return %c0_i32, %c0_i32_0 : i32, i32
  }
  func.func @transform_6(%arg0: i32) -> (i32, i32) {
    %c0_i32 = arith.constant 0 : i32
    %c0_i32_0 = arith.constant 0 : i32
    %c0_i32_1 = arith.constant 0 : i32
    return %c0_i32, %c0_i32_0 : i32, i32
  }
  func.func @transform_7(%arg0: i32) -> (i32, i32, i32) {
    %c0_i32 = arith.constant 0 : i32
    %c0_i32_0 = arith.constant 0 : i32
    %c0_i32_1 = arith.constant 0 : i32
    return %arg0, %c0_i32, %c0_i32_0 : i32, i32, i32
  }
}

</mosaic_0001>

<bundles_post_ra>
// kernel: tpu_custom_call.1
= control target key start
LH: loop header
LB: loop body
LE: loop exit
PB: predicated region body
PF: predicated region fallthrough
CT: control target
= control target key end

     0   :  { %12 = vsyncpa [#allocation4], 0  ;;  %s1897_s0 = inlined_call_operand.vmem [shape: bf16[2,64,256], index: 0, kind: input, shape index: {}]   ;;  %s1898_s1 = inlined_call_operand.hbm [shape: bf16[16,64], index: 1, kind: input, shape index: {}]   ;;  %s1899_s2 = inlined_call_operand.vmem [shape: f32[16,1], index: 2, kind: input, shape index: {}]   ;;  %s1900_s3 = inlined_call_operand.hbm [shape: bf16[3,16,48], index: 3, kind: input, shape index: {}]   ;;  %s1901_s4 = inlined_call_operand.vmem [shape: f32[16,1], index: 4, kind: input, shape index: {}]   ;;  %s1902_s5 = inlined_call_operand.vmem [shape: bf16[64,16], index: 5, kind: input, shape index: {}]   ;;  %s1903_s6 = inlined_call_operand.vmem [shape: f32[64,1], index: 6, kind: input, shape index: {}]   ;;  %s1904_s7 = inlined_call_operand.hbm [shape: f32[2,64,256], index: 7, kind: output, shape index: {}]  }
   0x1   :  { %13 = vsyncpa [#allocation7], 0 }
   0x2   :  { %14 = vsyncpa [#allocation5], 0 }
   0x3   :  { %16 = vsyncpa [#allocation5 + $0x1], 0  ;;  %s1529_s24 = smov 0   ;;  %s1531_s25 = smov 0  }
   0x4   :  { %s1533_s26 = smov 0   ;;  %s1535_s27 = smov 0  }
   0x5 LB: > { %s1550_s28 = sadd.s32 4294967295, %s1474_s27   ;;  %s1196_s29 = sadd.s32 4294967294, %s1474_s27   ;;  %s1474_s27 = sphi %s1535_s27, %s1920_s27   ;;  %s1470_s26 = sphi %s1533_s26, %s1919_s26   ;;  %s1466_s25 = sphi %s1531_s25, %s1918_s25   ;;  %s1462_s24 = sphi %s1529_s24, %s1917_s24  }
   0x6   : > { %s1554_s30 = sadd.s32 1, %s1474_s27   ;;  %s181_s8 = sadd.s32 1, %s1470_s26 }
   0x7   : > { %s178_s9 = ssub.s32 %s1474_s27, %s1554_s30  ;;  %p191_p0 = scmp.ne.s32.totalorder %s1470_s26, %s1466_s25 }
   0x8   : > { %p179_p1 = scmp.eq.s32.totalorder %s178_s9, 0  ;;  %p192_p2 = scmp.eq.s32.totalorder %s1550_s28, 1 }
   0x9   : > { %p197_p3 = scmp.ne.s32.totalorder %s1466_s25, %s1462_s24  ;;  %p198_p4 = scmp.eq.s32.totalorder %s1196_s29, 1 }
   0xa   : > { %s1565_s10 = scalar_select %p179_p1, %s1470_s26, %s181_s8  }
   0xb   : > { %p1567_p5 = por %p192_p2, %p191_p0  ;;  %p1571_p6 = por %p198_p4, %p197_p3 }
   0xc   : > { %p1197_p7 = scmp.ge.s32.totalorder %s1474_s27, 1  ;;  %p205_p8 = scmp.lt.s32.totalorder %s1474_s27, 3 }
   0xd   : > { %s1907_s12 = scalar_select %p1571_p6, 1, 0 }
   0xe   : > { %p1905_p9 = scmp.eq.s32.totalorder %s1550_s28, 0  ;;  %p1578_p10 = pnand %p1197_p7, %p205_p8 }
   0xf   : > { %s1476_s14 = smov [#allocation3]   ;;  %s1477_s17 = smov [#allocation6]  }
  0x10   : > { %s217_s15 = sshll.u32 %s1476_s14, 4  ;;  %p1265_p11 = pneg %p1578_p10  ;;  %s218_s15 = int_to_ptr.vmem [resolvable:$true] %s217_s15 }
  0x11   : > { %s233_s18 = sshll.u32 %s1477_s17, 4  ;;  %s1365_s19 = scalar_lea.vmem %s218_s15, 128  ;;  %s234_s18 = int_to_ptr.vmem [resolvable:$true] %s233_s18 }
  0x12   : > { %p1586_p12 = pnand %p1905_p9, %p1265_p11  ;;  %p1366_p0 = scmp.ne.s32.totalorder %s218_s15, %s1365_s19 }
  0x13   : > { %p1373_p3 = scmp.lt.s32.totalorder %s218_s15, %s218_s15  ;;  %p1374_p4 = scmp.lt.s32.totalorder %s1365_s19, %s1365_s19 }
  0x14   : > { %p1356_p13 = pneg %p1586_p12 }
  0x15   : > { %p1375_p7 = por %p1374_p4, %p1373_p3 }
  0x16   : > { %p1368_p1 = pnand %p1366_p0, %p1356_p13 }
  0x18   : > { %p1369_p2 = pneg %p1368_p1 }
  0x1a   : > { %p1376_p8 = pnand %p1375_p7, %p1369_p2 }
  0x1c   : > { %1379 = shalt.err (!%p1376_p8)
}
  0x1d   : > { %s1478_s20 = smov 64   ;;  %s1479_s21 = smov 4  }
  0x1e   : > { %1268 = dma.hbm_to_vmem [thread:$0]  (!%p1586_p12), %s1898_s1, 128, %s218_s15, [#allocation4], %s1478_s20, %s1478_s20, %s1479_s21  }
  0x1f   : > { %s1391_s29 = scalar_lea.vmem %s234_s18, 384  ;;  %p1399_p9 = scmp.lt.s32.totalorder %s234_s18, %s234_s18 }
  0x20   : > { %p1392_p11 = scmp.ne.s32.totalorder %s234_s18, %s1391_s29  ;;  %p1400_p6 = scmp.lt.s32.totalorder %s1391_s29, %s1391_s29 }
  0x22   : > { %p1394_p0 = pnand %p1392_p11, %p1356_p13  ;;  %p1401_p3 = por %p1400_p6, %p1399_p9 }
  0x24   : > { %p1395_p1 = pneg %p1394_p0 }
  0x26   : > { %p1402_p2 = pnand %p1401_p3, %p1395_p1 }
  0x28   : > { %1405 = shalt.err (!%p1402_p2)
}
  0x29   : > { %1271 = dma.hbm_to_vmem [thread:$0]  (!%p1586_p12), %s1900_s3, 384, %s234_s18, [#allocation7], %s1478_s20, %s1478_s20, %s1479_s21  }
  0x2a   : > { %266 = sbr.rel (%p1578_p10) target bundleno = 1017 (0x3f9), region = 48  ;;  %p1910_p4 = scmp.eq.s32.totalorder (!%p1578_p10), %s1550_s28, 0 }
  0x2f   : > { %1449 = dma.done.wait (%p1910_p4), [#allocation4], 128   ;;  %p1911_p13 = pmov %p1910_p4 }
  0x30   : > { %p1912_p7 = pmov %p1910_p4 }
  0x31   : > { %1451 = vsyncadd (%p1911_p13), [#allocation4], 4294967168 }
  0x32   : > { %1453 = dma.done.wait (%p1912_p7), [#allocation7], 384   ;;  %p1913_p6 = pmov %p1910_p4 }
  0x33   : > { %p302_p9 = scmp.lt.s32.totalorder %s1550_s28, 1  ;;  %v1480_v0 = vmov 0   ;;  %v318_v10 = vld [vmem:[%s1899_s2] sm:$0xff]  ;;  %v319_v14 = vld [vmem:[%s1899_s2 + $0x8] sm:$0xff]  ;;  %vm375_vm0 = vcmask 523264   ;;  %vm428_vm1 = vcmask 257024  }
  0x34   : > { %1455 = vsyncadd (%p1913_p6), [#allocation7], 4294966912  ;;  %411 = vmatprep.mubr.bf16.mxu0 %v1480_v0  ;;  %1325 = vset.pattern.permute.xlu0 %v1480_v0  ;;  %v1335_v19 = vld [vmem:[#allocation3] sm:$0xff]   ;;  %429 = vst.msk [vmem:[#allocation2] sm:$0xf] %vm428_vm1, %v1480_v0  ;;  %s1481_s22 = smov 32  }
  0x35   : > { %s303_s13 = scalar_select %p302_p9, %s1550_s28, 1  ;;  %746 = vmatprep.mubr.bf16.mxu1 %v1480_v0  ;;  %1326 = vset.pattern.permute.xlu1 %v1480_v0  ;;  %430 = vst.msk [vmem:[#allocation2 + $0xc] sm:$0xf] %vm428_vm1, %v1480_v0  ;;  %431 = vst.msk [vmem:[#allocation2 + $0x18] sm:$0xf] %vm428_vm1, %v1480_v0  ;;  %vm462_vm2 = vcmask 1043712  }
  0x36   : > { %322 = vperm.xlu0 %1325, %v318_v10   ;;  %432 = vst.msk [vmem:[#allocation2 + $0x24] sm:$0xf] %vm428_vm1, %v1480_v0  ;;  %435 = vst.msk [vmem:[#allocation2 + $0x8] sm:$0xf] %vm428_vm1, %v1480_v0  ;;  %s1482_s23 = smov 16   ;;  %s1483_s29 = smov 112  }
  0x37   : > { %s1251_s14 = sshll.u32 %s303_s13, 6  ;;  %436 = vst.msk [vmem:[#allocation2 + $0x14] sm:$0xf] %vm428_vm1, %v1480_v0  ;;  %437 = vst.msk [vmem:[#allocation2 + $0x20] sm:$0xf] %vm428_vm1, %v1480_v0  ;;  %s1484_s8 = smov 111  }
  0x38   : > { %s306_s17 = scalar_lea.vmem %s1897_s0, %s1251_s14  ;;  %438 = vst.msk [vmem:[#allocation2 + $0x2c] sm:$0xf] %vm428_vm1, %v1480_v0  ;;  %439 = vst.msk [vmem:[#allocation2 + $0x38] sm:$0xf] %vm428_vm1, %v1480_v0  ;;  %s1485_s9 = smov 113   ;;  %vm463_vm3 = vcmask 1047556  }
  0x39   : > { %v1627_v1 = vld [vmem:[%s306_s17 + $0x30] sm:$0xff]  ;;  %v1629_v2 = vld [vmem:[%s306_s17 + $0x38] sm:$0xff]  ;;  %v1631_v3 = vld [vmem:[%s306_s17 + $0x20] sm:$0xff]  ;;  %440 = vst.msk [vmem:[#allocation2 + $0x44] sm:$0xf] %vm428_vm1, %v1480_v0  ;;  %vm482_vm4 = vcmask 1043584  }
  0x3a   : > { %v1215_v4 = vcombine.high %v1627_v1, %v1629_v2  ;;  %v1214_v5 = vcombine.low %v1627_v1, %v1629_v2  ;;  %v1637_v6 = vld [vmem:[%s306_s17 + $0x28] sm:$0xff]  ;;  %v1641_v8 = vld [vmem:[%s306_s17 + $0x10] sm:$0xff]  ;;  %v1643_v9 = vld [vmem:[%s306_s17 + $0x18] sm:$0xff]  ;;  %327 = vperm.xlu0 %1325, %v319_v14   ;;  %vm455_vm5 = vcmask 261120   ;;  %vm475_vm7 = vcmask 130048   ;;  %s299_s15 = sand.u32 1, %s1466_s25  }
  0x3b   : > { %v1213_v7 = vcombine.high %v1631_v3, %v1637_v6  ;;  %v1212_v11 = vcombine.low %v1631_v3, %v1637_v6  ;;  %v1650_v12 = vld [vmem:[%s306_s17] sm:$0xff]  ;;  %v1652_v13 = vld [vmem:[%s306_s17 + $0x8] sm:$0xff]  ;;  %v1211_v15 = vcombine.high %v1641_v8, %v1643_v9  ;;  %v1210_v16 = vcombine.low %v1641_v8, %v1643_v9  ;;  %vm1697_vm6 = vmor %vm463_vm3, %vm462_vm2  ;;  %s1204_s16 = sshll.u32 %s299_s15, 7  ;;  %s1254_s18 = sshll.u32 %s1550_s28, 11 }
  0x3c   : > { %387 = vmatprep.subr.bf16.mxu0 %v1215_v4  ;;  %v1209_v17 = vcombine.high %v1650_v12, %v1652_v13  ;;  %v1208_v18 = vcombine.low %v1650_v12, %v1652_v13  ;;  %vm485_vm8 = vcmask 125952   ;;  %vm483_vm9 = vmor %vm463_vm3, %vm482_vm4  ;;  %vm611_vm10 = vcmask 924672   ;;  %s1815_s17 = scalar_lea.vmem [#allocation8], %s1204_s16 }
  0x3d   : > { %388 = vmatpush1.bf16.msra.mxu0 %v1214_v5  ;;  %vm698_vm11 = vcmask 916480   ;;  %vm783_vm12 = vcmask 908288   ;;  %vm624_vm13 = vcmask 392192   ;;  %s1112_s19 = sshll.u32 %s1815_s17, 4  ;;  %s1851_s19 = int_to_ptr.vmem [resolvable:$true] %s1112_s19 }
  0x3e   : > { %389 = vmatprep.subr.bf16.mxu0 %v1213_v7  ;;  %s1406_s28 = scalar_lea.vmem %s1851_s19, 2048 }
  0x3f   : > { %p1407_p10 = scmp.ne.s32.totalorder %s1851_s19, %s1406_s28 }
  0x40   : > { %v1336_v35 = vld [vmem:[#allocation2 + $0x38] ss:$12 sps:$4 sm:$0xff]  }
  0x41   : > { %390 = vmatpush1.bf16.msra.mxu0 %v1212_v11  ;;  %p1408_p12 = pnand %p1407_p10, %p1567_p5 }
  0x42   : > { %391 = vmatprep.subr.bf16.mxu0 %v1211_v15 }
  0x43   : > { %p1409_p8 = pneg %p1408_p12 }
  0x45   : > { %392 = vmatpush1.bf16.msra.mxu0 %v1210_v16  ;;  %v851_v16 = vld [vmem:[%s1901_s4 + $0x8] sm:$0xff] }
  0x46   : > { %393 = vmatprep.subr.bf16.mxu0 %v1209_v17  ;;  %v881_v17 = vld [vmem:[%s1903_s6 + $0x8] sm:$0xff] }
  0x49   : > { %394 = vmatpush1.bf16.msra.mxu0 %v1208_v18  ;;  %v883_v18 = vld [vmem:[%s1903_s6 + $0x18] sm:$0xff] }
  0x4c   : > { %1216 = vmatmul.mubr.msk.bf16.vlgmr.msra.gmra.mxu0 %vm375_vm0, %v1335_v19  ;;  %v885_v19 = vld [vmem:[%s1903_s6 + $0x28] sm:$0xff] }
  0x4d   : > { %660 = vmatprep.mubr.bf16.mxu0 %v1480_v0 }
  0xb1   : > { %v323_v20 = vpop.permute.xlu0 %322 }
  0xb5   : > { %v328_v25 = vpop.permute.xlu0 %327 }
 0x10c   : > { %v413_v21 = vpop.f32.mrf.mxu0 }
 0x10d   : > { %v414_v22 = vadd.f32 %v413_v21, %v323_v20  ;;  %v887_v21 = vld [vmem:[%s1903_s6 + $0x38] sm:$0xff] }
 0x10e   : > { %v415_v23 = vpop.f32.mrf.mxu0 }
 0x10f   : > { %v416_v24 = vadd.f32 %v415_v23, %v323_v20  ;;  %v422_v27 = vmax.f32 %v414_v22, 0.0  ;;  %v850_v20 = vld [vmem:[%s1901_s4] sm:$0xff]  ;;  %v882_v23 = vld [vmem:[%s1903_s6 + $0x10] sm:$0xff] }
 0x110   : > { %v417_v26 = vpop.f32.mrf.mxu0  ;;  %v880_v22 = vld [vmem:[%s1903_s6] sm:$0xff] }
 0x111   : > { %v423_v28 = vmax.f32 %v416_v24, 0.0  ;;  %v418_v29 = vadd.f32 %v417_v26, %v328_v25  ;;  %v884_v24 = vld [vmem:[%s1903_s6 + $0x20] sm:$0xff] }
 0x112   : > { %v419_v30 = vpop.f32.mrf.mxu0 }
 0x113   : > { %v1252_v31 = vpack.c.bf16 %v423_v28, %v422_v27  ;;  %v420_v32 = vadd.f32 %v419_v30, %v328_v25  ;;  %v424_v33 = vmax.f32 %v418_v29, 0.0  ;;  %v886_v25 = vld [vmem:[%s1903_s6 + $0x30] sm:$0xff] }
 0x115   : > { %v425_v34 = vmax.f32 %v420_v32, 0.0  ;;  %449 = vrot.lane.b32.xlu0 %v1252_v31, %s1481_s22  ;;  %469 = vrot.lane.b32.xlu1 %v1252_v31, %s1482_s23  ;;  %v1353_v38 = vpack.c.bf16 %v424_v33, %v422_v27 }
 0x117   : > { %v1253_v36 = vpack.c.bf16 %v425_v34, %v424_v33  ;;  %v1352_v37 = vpack.c.bf16 %v425_v34, %v423_v28 }
 0x119   : > { %471 = vrot.lane.b32.xlu1 %v1253_v36, %s1482_s23  ;;  %696 = vrot.lane.b32.xlu0 %v1336_v35, %s1483_s29 }
 0x11d   : > { %451 = vrot.lane.b32.xlu1 %v1253_v36, %s1481_s22  ;;  %781 = vrot.lane.b32.xlu0 %v1336_v35, %s1484_s8  ;;  %s1848_s22 = scalar_lea.hbm %s1904_s7, %s1254_s18 }
 0x121   : > { %609 = vrot.lane.b32.xlu1 %v1336_v35, %s1485_s9  ;;  %607 = vrot.lane.b32.xlu0 %v1352_v37, %s1485_s9 }
 0x125   : > { %694 = vrot.lane.b32.xlu1 %v1352_v37, %s1483_s29  ;;  %605 = vrot.lane.b32.xlu0 %v1353_v38, %s1485_s9 }
 0x129   : > { %779 = vrot.lane.b32.xlu1 %v1352_v37, %s1484_s8  ;;  %777 = vrot.lane.b32.xlu0 %v1353_v38, %s1484_s8 }
 0x12d   : > { %692 = vrot.lane.b32.xlu1 %v1353_v38, %s1483_s29 }
 0x187   : > { %v450_v40 = vpop.permute.xlu0 %449  ;;  %v470_v41 = vpop.permute.xlu1 %469 }
 0x188   : > { %v453_v42 = vrot.slane %v450_v40, 4  ;;  %v473_v43 = vrot.slane %v470_v41, 4 }
 0x18a   : > { %v456_v44 = vsel %vm455_vm5, %v453_v42, %v450_v40  ;;  %466 = vst.msk [vmem:[#allocation2 + $0x8] sm:$0xf] %vm428_vm1, %v453_v42  ;;  %v476_v45 = vsel %vm475_vm7, %v473_v43, %v470_v41 }
 0x18b   : > { %486 = vst.msk [vmem:[#allocation2 + $0x20] sm:$0xf] %vm485_vm8, %v473_v43  ;;  %v472_v46 = vpop.permute.xlu1 %471  ;;  %v697_v47 = vpop.permute.xlu0 %696  ;;  %v1345_v43 = vld [vmem:[#allocation6] sm:$0xff]  }
 0x18c   : > { %465 = vst.msk [vmem:[#allocation2] sm:$0xff] %vm1697_vm6, %v456_v44  ;;  %v474_v48 = vrot.slane %v472_v46, 4 }
 0x18d   : > { %484 = vst.msk [vmem:[#allocation2 + $0x18] sm:$0xff] %vm483_vm9, %v476_v45 }
 0x18e   : > { %v477_v49 = vsel %vm475_vm7, %v474_v48, %v472_v46  ;;  %488 = vst.msk [vmem:[#allocation2 + $0x2c] sm:$0xf] %vm485_vm8, %v474_v48 }
 0x18f   : > { %487 = vst.msk [vmem:[#allocation2 + $0x24] sm:$0xff] %vm483_vm9, %v477_v49  ;;  %v452_v50 = vpop.permute.xlu1 %451  ;;  %v782_v51 = vpop.permute.xlu0 %781 }
 0x190   : > { %v454_v52 = vrot.slane %v452_v50, 4 }
 0x192   : > { %v457_v53 = vsel %vm455_vm5, %v454_v52, %v452_v50  ;;  %468 = vst.msk [vmem:[#allocation2 + $0x14] sm:$0xf] %vm428_vm1, %v454_v52 }
 0x193   : > { %467 = vst.msk [vmem:[#allocation2 + $0xc] sm:$0xff] %vm1697_vm6, %v457_v53  ;;  %v610_v54 = vpop.permute.xlu1 %609  ;;  %v608_v55 = vpop.permute.xlu0 %607 }
 0x194   : > { %v617_v56 = vsel %vm611_vm10, %v608_v55, %v610_v54 }
 0x195   : > { %638 = vmatprep.subr.bf16.mxu0 %v617_v56  ;;  %v1337_v57 = vld [vmem:[#allocation2 + $0x20] ss:$12 sps:$4 sm:$0xff]  }
 0x196   : > { %603 = vrot.lane.b32.xlu0 %v1337_v57, %s1485_s9  ;;  %v1339_v5 = vld [vmem:[#allocation2 + $0x1c] ss:$12 sps:$4 sm:$0xff]   ;;  %v1341_v11 = vld [vmem:[#allocation2 + $0x18] ss:$12 sps:$4 sm:$0xff]  }
 0x197   : > { %v695_v58 = vpop.permute.xlu1 %694  ;;  %v606_v59 = vpop.permute.xlu0 %605 }
 0x198   : > { %v704_v60 = vsel %vm698_vm11, %v695_v58, %v697_v47  ;;  %v616_v61 = vsel %vm611_vm10, %v606_v59, %v608_v55 }
 0x199   : > { %724 = vmatprep.subr.bf16.mxu1 %v704_v60  ;;  %639 = vmatpush1.bf16.msra.mxu0 %v616_v61  ;;  %v1338_v62 = vld [vmem:[#allocation2 + $0x8] ss:$12 sps:$4 sm:$0xff]   ;;  %v1347_v60 = vld [vmem:[#allocation6 + $0x8] sm:$0xff]   ;;  %v493_v61 = vlaneseq }
 0x19a   : > { %597 = vrot.lane.b32.xlu1 %v1338_v62, %s1485_s9  ;;  %690 = vrot.lane.b32.xlu0 %v1337_v57, %s1483_s29  ;;  %v1342_v14 = vld [vmem:[#allocation2 + $0x4] ss:$12 sps:$4 sm:$0xff]   ;;  %v1344_v15 = vld [vmem:[#allocation2] ss:$12 sps:$4 sm:$0xff]  }
 0x19b   : > { %v1715_v63 = vpop.permute.xlu1 %779  ;;  %v778_v26 = vpop.permute.xlu0 %777 }
 0x19c   : > { %v1721_v4 = vsel %vm783_vm12, %v1715_v63, %v782_v51  ;;  %v788_v46 = vsel %vm783_vm12, %v778_v26, %v1715_v63 }
 0x19e   : > { %601 = vrot.lane.b32.xlu1 %v1339_v5, %s1485_s9  ;;  %775 = vrot.lane.b32.xlu0 %v1337_v57, %s1484_s8  ;;  %v1346_v57 = vld [vmem:[#allocation6 + $0x10] sm:$0xff]  }
 0x19f   : > { %v693_v7 = vpop.permute.xlu1 %692 }
 0x1a0   : > { %v703_v10 = vsel %vm698_vm11, %v693_v7, %v695_v58 }
 0x1a1   : > { %725 = vmatpush1.bf16.msra.mxu1 %v703_v10 }
 0x1a2   : > { %599 = vrot.lane.b32.xlu1 %v1341_v11, %s1485_s9  ;;  %684 = vrot.lane.b32.xlu0 %v1338_v62, %s1483_s29 }
 0x1a6   : > { %688 = vrot.lane.b32.xlu1 %v1339_v5, %s1483_s29  ;;  %595 = vrot.lane.b32.xlu0 %v1342_v14, %s1485_s9 }
 0x1aa   : > { %773 = vrot.lane.b32.xlu1 %v1339_v5, %s1484_s8  ;;  %593 = vrot.lane.b32.xlu0 %v1344_v15, %s1485_s9 }
 0x1ae   : > { %686 = vrot.lane.b32.xlu1 %v1341_v11, %s1483_s29  ;;  %769 = vrot.lane.b32.xlu0 %v1338_v62, %s1484_s8  ;;  %v494_v62 = vand.u32 127, %v493_v61 }
 0x1b0   : > { %v500_v7 = vand.u32 15, %v494_v62 }
 0x1b2   : > { %682 = vrot.lane.b32.xlu1 %v1342_v14, %s1483_s29  ;;  %771 = vrot.lane.b32.xlu0 %v1341_v11, %s1484_s8  ;;  %vm520_vm14 = vcmp.ne.s32.totalorder %v500_v7, 0  ;;  %vm526_vm0 = vcmp.ne.s32.totalorder %v500_v7, 15 }
 0x1b6   : > { %767 = vrot.lane.b32.xlu1 %v1342_v14, %s1484_s8  ;;  %765 = vrot.lane.b32.xlu0 %v1344_v15, %s1484_s8  ;;  %s1487_s8 = smov [#allocation8]  }
 0x1b7   : > { %s1410_s9 = sshll.u32 %s1487_s8, 4  ;;  %s1411_s9 = int_to_ptr.vmem [resolvable:$false] %s1410_s9 }
 0x1b8   : > { %s1412_s13 = scalar_lea.vmem %s1411_s9, 4096  ;;  %p1413_p11 = scmp.lt.s32.totalorder %s1851_s19, %s1411_s9 }
 0x1b9   : > { %p1414_p0 = scmp.lt.s32.totalorder %s1412_s13, %s1406_s28 }
 0x1ba   : > { %680 = vrot.lane.b32.xlu1 %v1344_v15, %s1483_s29  ;;  %859 = vperm.xlu0 %1325, %v851_v16   ;;  %v1486_v15 = vmov 0.0   ;;  %s1856_s29 = scalar_lea.sflag [#allocation5], %s299_s15 }
 0x1bb   : > { %v1219_v16 = vsel %vm520_vm14, 1.0, %v1486_v15  ;;  %p1415_p1 = por %p1414_p0, %p1413_p11 }
 0x1bd   : > { %p1416_p3 = pnand %p1415_p1, %p1409_p8 }
 0x1be   : > { %895 = vperm.xlu0 %1325, %v881_v17   ;;  %854 = vperm.xlu1 %1326, %v850_v20  }
 0x1c2   : > { %905 = vperm.xlu0 %1325, %v883_v18   ;;  %890 = vperm.xlu1 %1326, %v880_v22  }
 0x1c6   : > { %915 = vperm.xlu0 %1325, %v885_v19   ;;  %900 = vperm.xlu1 %1326, %v882_v23   ;;  %v1221_v19 = vsel %vm526_vm0, 1.0, %v1486_v15 }
 0x1ca   : > { %925 = vperm.xlu0 %1325, %v887_v21   ;;  %910 = vperm.xlu1 %1326, %v884_v24  }
 0x1ce   : > { %920 = vperm.xlu1 %1326, %v886_v25  }
 0x208   : > { %v604_v27 = vpop.permute.xlu0 %603 }
 0x20c   : > { %v598_v28 = vpop.permute.xlu1 %597  ;;  %v691_v29 = vpop.permute.xlu0 %690 }
 0x210   : > { %v602_v30 = vpop.permute.xlu1 %601  ;;  %v776_v31 = vpop.permute.xlu0 %775 }
 0x211   : > { %v615_v32 = vsel %vm611_vm10, %v602_v30, %v604_v27 }
 0x212   : > { %640 = vmatprep.subr.bf16.mxu0 %v615_v32 }
 0x214   : > { %v600_v33 = vpop.permute.xlu1 %599  ;;  %v685_v34 = vpop.permute.xlu0 %684 }
 0x215   : > { %v614_v35 = vsel %vm611_vm10, %v600_v33, %v602_v30 }
 0x216   : > { %641 = vmatpush1.bf16.msra.mxu0 %v614_v35 }
 0x218   : > { %v689_v36 = vpop.permute.xlu1 %688  ;;  %v596_v37 = vpop.permute.xlu0 %595 }
 0x219   : > { %v613_v38 = vsel %vm611_vm10, %v596_v37, %v598_v28  ;;  %v702_v39 = vsel %vm698_vm11, %v689_v36, %v691_v29 }
 0x21a   : > { %642 = vmatprep.subr.bf16.mxu0 %v613_v38  ;;  %726 = vmatprep.subr.bf16.mxu1 %v702_v39 }
 0x21c   : > { %v774_v40 = vpop.permute.xlu1 %773  ;;  %v594_v41 = vpop.permute.xlu0 %593 }
 0x21d   : > { %v612_v42 = vsel %vm611_vm10, %v594_v41, %v596_v37  ;;  %v787_v48 = vsel %vm783_vm12, %v774_v40, %v776_v31 }
 0x21e   : > { %643 = vmatpush1.bf16.msra.mxu0 %v612_v42 }
 0x21f   : > { %809 = vmatprep.subr.bf16.mxu0 %v1721_v4  ;;  %v495_v4 = vadd.s32 128, %v494_v62 }
 0x220   : > { %v687_v44 = vpop.permute.xlu1 %686  ;;  %v770_v45 = vpop.permute.xlu0 %769 }
 0x221   : > { %1233 = vmatmul.mubr.msk.bf16.vlgmr.msra.gmra.mxu0 %vm624_vm13, %v1345_v43  ;;  %v701_v47 = vsel %vm698_vm11, %v687_v44, %v689_v36  ;;  %v507_v10 = vand.u32 15, %v495_v4  ;;  %v1035_v4 = vunpack.c.h.bf16 %v1650_v12 }
 0x222   : > { %727 = vmatpush1.bf16.msra.mxu1 %v701_v47  ;;  %810 = vmatpush1.bf16.msra.mxu0 %v788_v46 }
 0x223   : > { %811 = vmatprep.subr.bf16.mxu0 %v787_v48  ;;  %831 = vmatprep.mubr.bf16.mxu0 %v1480_v0  ;;  %vm521_vm15 = vcmp.ne.s32.totalorder %v507_v10, 0  ;;  %vm527_vm1 = vcmp.ne.s32.totalorder %v507_v10, 15 }
 0x224   : > { %v683_v49 = vpop.permute.xlu1 %682  ;;  %v772_v50 = vpop.permute.xlu0 %771  ;;  %v1220_v18 = vsel %vm521_vm15, 1.0, %v1486_v15  ;;  %v1222_v22 = vsel %vm527_vm1, 1.0, %v1486_v15 }
 0x225   : > { %v786_v51 = vsel %vm783_vm12, %v772_v50, %v774_v40  ;;  %v700_v52 = vsel %vm698_vm11, %v683_v49, %v685_v34 }
 0x226   : > { %728 = vmatprep.subr.bf16.mxu1 %v700_v52  ;;  %812 = vmatpush1.bf16.msra.mxu0 %v786_v51 }
 0x228   : > { %v768_v53 = vpop.permute.xlu1 %767  ;;  %v766_v54 = vpop.permute.xlu0 %765 }
 0x229   : > { %v784_v55 = vsel %vm783_vm12, %v766_v54, %v768_v53  ;;  %v785_v56 = vsel %vm783_vm12, %v768_v53, %v770_v45 }
 0x22a   : > { %813 = vmatprep.subr.bf16.mxu0 %v785_v56  ;;  %v1348_v56 = vld [vmem:[%s1902_s5] sm:$0xff]  }
 0x22b   : > { %814 = vmatpush1.bf16.msra.mxu0 %v784_v55 }
 0x22c   : > { %v681_v58 = vpop.permute.xlu1 %680 }
 0x22d   : > { %v699_v59 = vsel %vm698_vm11, %v681_v58, %v683_v49  ;;  %v1350_v58 = vld [vmem:[%s1902_s5 + $0x10] sm:$0xff]  }
 0x22e   : > { %729 = vmatpush1.bf16.msra.mxu1 %v699_v59  ;;  %1237 = vmatmul.mubr.msk.bf16.vlgmr.msra.gmra.mxu0 %vm624_vm13, %v1346_v57  ;;  %v1349_v57 = vld [vmem:[%s1902_s5 + $0x8] sm:$0xff]   ;;  %v1351_v59 = vld [vmem:[%s1902_s5 + $0x18] sm:$0xff]  }
 0x231   : > { %1235 = vmatmul.mubr.msk.bf16.vlgmr.msra.gmra.mxu1 %vm624_vm13, %v1347_v60  ;;  %v1034_v60 = vunpack.c.l.bf16 %v1650_v12 }
 0x232   : > { %993 = vmatprep.mubr.bf16.mxu1 %v1480_v0 }
 0x235   : > { %v860_v43 = vpop.permute.xlu0 %859 }
 0x239   : > { %v855_v44 = vpop.permute.xlu1 %854 }
 0x23d   : > { %v891_v61 = vpop.permute.xlu1 %890 }
 0x2e1   : > { %v662_v63 = vpop.f32.mrf.mxu0 }
 0x2e2   : > { %v671_v21 = vmul.f32 %v1219_v16, %v662_v63 }
 0x2e3   : > { %v664_v5 = vpop.f32.mrf.mxu0 }
 0x2e4   : > { %v672_v24 = vmul.f32 %v1220_v18, %v664_v5 }
 0x2e5   : > { %v666_v11 = vpop.f32.mrf.mxu0 }
 0x2e6   : > { %v673_v29 = vmul.f32 %v1219_v16, %v666_v11  ;;  %v896_v11 = vpop.permute.xlu0 %895 }
 0x2e7   : > { %v668_v14 = vpop.f32.mrf.mxu0 }
 0x2e8   : > { %v674_v34 = vmul.f32 %v1220_v18, %v668_v14  ;;  %v1037_v18 = vunpack.c.h.bf16 %v1652_v13 }
 0x2ee   : > { %v833_v17 = vpop.f32.mrf.mxu0 }
 0x2ef   : > { %v842_v26 = vmul.f32 %v1221_v19, %v833_v17 }
 0x2f0   : > { %v835_v20 = vpop.f32.mrf.mxu0 }
 0x2f1   : > { %v748_v23 = vpop.f32.mrf.mxu1  ;;  %v843_v30 = vmul.f32 %v1222_v22, %v835_v20 }
 0x2f2   : > { %v837_v25 = vpop.f32.mrf.mxu0  ;;  %v749_v27 = vadd.f32 %v748_v23, %v671_v21  ;;  %v901_v23 = vpop.permute.xlu1 %900 }
 0x2f3   : > { %v750_v28 = vpop.f32.mrf.mxu1  ;;  %v844_v35 = vmul.f32 %v1221_v19, %v837_v25 }
 0x2f4   : > { %v751_v31 = vadd.f32 %v750_v28, %v672_v24  ;;  %v839_v32 = vpop.f32.mrf.mxu0  ;;  %v846_v38 = vadd.f32 %v842_v26, %v749_v27 }
 0x2f5   : > { %v752_v33 = vpop.f32.mrf.mxu1  ;;  %v845_v40 = vmul.f32 %v1222_v22, %v839_v32  ;;  %v1038_v22 = vunpack.c.l.bf16 %v1641_v8  ;;  %v1040_v32 = vunpack.c.l.bf16 %v1643_v9 }
 0x2f6   : > { %v847_v36 = vadd.f32 %v843_v30, %v751_v31  ;;  %v753_v37 = vadd.f32 %v752_v33, %v673_v29  ;;  %v862_v48 = vadd.f32 %v855_v44, %v846_v38  ;;  %v906_v33 = vpop.permute.xlu0 %905  ;;  %v1041_v38 = vunpack.c.h.bf16 %v1643_v9 }
 0x2f7   : > { %v754_v39 = vpop.f32.mrf.mxu1 }
 0x2f8   : > { %v848_v41 = vadd.f32 %v844_v35, %v753_v37  ;;  %v755_v42 = vadd.f32 %v754_v39, %v674_v34  ;;  %v863_v45 = vadd.f32 %v855_v44, %v847_v36  ;;  %v866_v53 = vmax.f32 %v862_v48, 0.0 }
 0x2f9   : > { %v1043_v48 = vunpack.c.h.bf16 %v1631_v3 }
 0x2fa   : > { %v864_v46 = vadd.f32 %v860_v43, %v848_v41  ;;  %v849_v47 = vadd.f32 %v845_v40, %v755_v42  ;;  %v867_v51 = vmax.f32 %v863_v45, 0.0  ;;  %v1042_v42 = vunpack.c.l.bf16 %v1631_v3 }
 0x2fc   : > { %v865_v49 = vadd.f32 %v860_v43, %v849_v47  ;;  %v868_v50 = vmax.f32 %v864_v46, 0.0  ;;  %v911_v43 = vpop.permute.xlu1 %910 }
 0x2fe   : > { %v869_v52 = vmax.f32 %v865_v49, 0.0  ;;  %v878_v55 = vpack.c.bf16 %v868_v50, %v866_v53  ;;  %v916_v53 = vpop.permute.xlu0 %915 }
 0x300   : > { %v879_v54 = vpack.c.bf16 %v869_v52, %v867_v51  ;;  %v1044_v52 = vunpack.c.l.bf16 %v1637_v6 }
 0x302   : > { %975 = vmatprep.subr.bf16.mxu1 %v879_v54 }
 0x303   : > { %976 = vmatpush1.bf16.msra.mxu1 %v878_v55 }
 0x306   : > { %1242 = vmatmul.mubr.msk.bf16.vlgmr.msra.gmra.mxu1 %vm475_vm7, %v1348_v56 }
 0x307   : > { %1003 = vmatprep.mubr.bf16.mxu1 %v1480_v0 }
 0x30e   : > { %1243 = vmatmul.mubr.msk.bf16.gmra.mxu1 %vm475_vm7, %v1349_v57 }
 0x30f   : > { %1013 = vmatprep.mubr.bf16.mxu1 %v1480_v0 }
 0x316   : > { %1244 = vmatmul.mubr.msk.bf16.gmra.mxu1 %vm475_vm7, %v1350_v58  ;;  %v1045_v58 = vunpack.c.h.bf16 %v1637_v6 }
 0x317   : > { %1023 = vmatprep.mubr.bf16.mxu1 %v1480_v0  ;;  %v1036_v0 = vunpack.c.l.bf16 %v1652_v13  ;;  %v1039_v13 = vunpack.c.h.bf16 %v1641_v8 }
 0x31e   : > { %1245 = vmatmul.mubr.msk.bf16.gmra.mxu1 %vm475_vm7, %v1351_v59 }
 0x3c6   : > { %v995_v62 = vpop.f32.mrf.mxu1 }
 0x3c7   : > { %v996_v63 = vadd.f32 %v995_v62, %v891_v61  ;;  %v1046_v62 = vunpack.c.l.bf16 %v1627_v1 }
 0x3c8   : > { %v997_v5 = vpop.f32.mrf.mxu1 }
 0x3c9   : > { %v1050_v7 = vadd.f32 %v1034_v60, %v996_v63  ;;  %v998_v10 = vadd.f32 %v997_v5, %v891_v61  ;;  %v921_v63 = vpop.permute.xlu1 %920 }
 0x3ca   : > { %v999_v14 = vpop.f32.mrf.mxu1 }
 0x3cb   : > { %v1066_v15 = vmax.f32 %v1050_v7, 0.0  ;;  %v1051_v16 = vadd.f32 %v1035_v4, %v998_v10  ;;  %v1000_v17 = vadd.f32 %v999_v14, %v896_v11 }
 0x3cc   : > { %v1001_v19 = vpop.f32.mrf.mxu1 }
 0x3cd   : > { %1082 = vst [vmem:[%s1815_s17] sm:$0xff] %v1066_v15  ;;  %v1067_v12 = vmax.f32 %v1051_v16, 0.0  ;;  %v1052_v20 = vadd.f32 %v1036_v0, %v1000_v17  ;;  %v1002_v21 = vadd.f32 %v1001_v19, %v896_v11  ;;  %v1047_v0 = vunpack.c.h.bf16 %v1627_v1  ;;  %v926_v17 = vpop.permute.xlu0 %925 }
 0x3ce   : > { %v1005_v24 = vpop.f32.mrf.mxu1  ;;  %v1048_v16 = vunpack.c.l.bf16 %v1629_v2  ;;  %v1049_v1 = vunpack.c.h.bf16 %v1629_v2 }
 0x3cf   : > { %1083 = vst [vmem:[%s1815_s17 + $0x8] sm:$0xff] %v1067_v12  ;;  %v1068_v25 = vmax.f32 %v1052_v20, 0.0  ;;  %v1053_v26 = vadd.f32 %v1037_v18, %v1002_v21  ;;  %v1006_v27 = vadd.f32 %v1005_v24, %v901_v23 }
 0x3d0   : > { %v1007_v28 = vpop.f32.mrf.mxu1 }
 0x3d1   : > { %1084 = vst [vmem:[%s1815_s17 + $0x10] sm:$0xff] %v1068_v25  ;;  %v1069_v29 = vmax.f32 %v1053_v26, 0.0  ;;  %v1054_v30 = vadd.f32 %v1038_v22, %v1006_v27  ;;  %v1008_v31 = vadd.f32 %v1007_v28, %v901_v23 }
 0x3d2   : > { %v1009_v34 = vpop.f32.mrf.mxu1 }
 0x3d3   : > { %1085 = vst [vmem:[%s1815_s17 + $0x18] sm:$0xff] %v1069_v29  ;;  %v1070_v35 = vmax.f32 %v1054_v30, 0.0  ;;  %v1055_v36 = vadd.f32 %v1039_v13, %v1008_v31  ;;  %v1010_v37 = vadd.f32 %v1009_v34, %v906_v33 }
 0x3d4   : > { %v1011_v39 = vpop.f32.mrf.mxu1 }
 0x3d5   : > { %1086 = vst [vmem:[%s1815_s17 + $0x20] sm:$0xff] %v1070_v35  ;;  %v1071_v8 = vmax.f32 %v1055_v36, 0.0  ;;  %v1056_v40 = vadd.f32 %v1040_v32, %v1010_v37  ;;  %v1012_v41 = vadd.f32 %v1011_v39, %v906_v33 }
 0x3d6   : > { %v1015_v44 = vpop.f32.mrf.mxu1 }
 0x3d7   : > { %1087 = vst [vmem:[%s1815_s17 + $0x28] sm:$0xff] %v1071_v8  ;;  %v1072_v45 = vmax.f32 %v1056_v40, 0.0  ;;  %v1057_v46 = vadd.f32 %v1041_v38, %v1012_v41  ;;  %v1016_v47 = vadd.f32 %v1015_v44, %v911_v43 }
 0x3d8   : > { %v1017_v49 = vpop.f32.mrf.mxu1 }
 0x3d9   : > { %1088 = vst [vmem:[%s1815_s17 + $0x30] sm:$0xff] %v1072_v45  ;;  %v1073_v9 = vmax.f32 %v1057_v46, 0.0  ;;  %v1058_v50 = vadd.f32 %v1042_v42, %v1016_v47  ;;  %v1018_v51 = vadd.f32 %v1017_v49, %v911_v43 }
 0x3da   : > { %v1019_v54 = vpop.f32.mrf.mxu1 }
 0x3db   : > { %1089 = vst [vmem:[%s1815_s17 + $0x38] sm:$0xff] %v1073_v9  ;;  %v1074_v55 = vmax.f32 %v1058_v50, 0.0  ;;  %v1059_v56 = vadd.f32 %v1043_v48, %v1018_v51  ;;  %v1020_v57 = vadd.f32 %v1019_v54, %v916_v53 }
 0x3dc   : > { %v1021_v59 = vpop.f32.mrf.mxu1 }
 0x3dd   : > { %1090 = vst [vmem:[%s1815_s17 + $0x40] sm:$0xff] %v1074_v55  ;;  %v1075_v3 = vmax.f32 %v1059_v56, 0.0  ;;  %v1060_v60 = vadd.f32 %v1044_v52, %v1020_v57  ;;  %v1022_v61 = vadd.f32 %v1021_v59, %v916_v53 }
 0x3de   : > { %v1025_v4 = vpop.f32.mrf.mxu1 }
 0x3df   : > { %1091 = vst [vmem:[%s1815_s17 + $0x48] sm:$0xff] %v1075_v3  ;;  %v1076_v5 = vmax.f32 %v1060_v60, 0.0  ;;  %v1061_v7 = vadd.f32 %v1045_v58, %v1022_v61  ;;  %v1026_v10 = vadd.f32 %v1025_v4, %v921_v63 }
 0x3e0   : > { %v1027_v11 = vpop.f32.mrf.mxu1 }
 0x3e1   : > { %1092 = vst [vmem:[%s1815_s17 + $0x50] sm:$0xff] %v1076_v5  ;;  %v1077_v6 = vmax.f32 %v1061_v7, 0.0  ;;  %v1062_v14 = vadd.f32 %v1046_v62, %v1026_v10  ;;  %v1028_v15 = vadd.f32 %v1027_v11, %v921_v63 }
 0x3e2   : > { %v1029_v18 = vpop.f32.mrf.mxu1 }
 0x3e3   : > { %1093 = vst [vmem:[%s1815_s17 + $0x58] sm:$0xff] %v1077_v6  ;;  %v1078_v19 = vmax.f32 %v1062_v14, 0.0  ;;  %v1063_v12 = vadd.f32 %v1047_v0, %v1028_v15  ;;  %v1030_v20 = vadd.f32 %v1029_v18, %v926_v17 }
 0x3e4   : > { %v1031_v21 = vpop.f32.mrf.mxu1 }
 0x3e5   : > { %1094 = vst [vmem:[%s1815_s17 + $0x60] sm:$0xff] %v1078_v19  ;;  %v1079_v22 = vmax.f32 %v1063_v12, 0.0  ;;  %v1064_v23 = vadd.f32 %v1048_v16, %v1030_v20  ;;  %v1032_v24 = vadd.f32 %v1031_v21, %v926_v17 }
 0x3e7   : > { %1095 = vst [vmem:[%s1815_s17 + $0x68] sm:$0xff] %v1079_v22  ;;  %v1080_v25 = vmax.f32 %v1064_v23, 0.0  ;;  %v1065_v26 = vadd.f32 %v1049_v1, %v1032_v24 }
 0x3e9   : > { %1096 = vst [vmem:[%s1815_s17 + $0x70] sm:$0xff] %v1080_v25  ;;  %v1081_v27 = vmax.f32 %v1065_v26, 0.0 }
 0x3eb   : > { %1097 = vst [vmem:[%s1815_s17 + $0x78] sm:$0xff] %v1081_v27 }
 0x3ec   : > { %1419 = shalt.err (!%p1416_p3)
}
 0x3ed   : > { %s1420_s14 = scalar_lea.hbm %s1848_s22, 2048  ;;  %s1424_s17 = scalar_lea.hbm %s1904_s7, 4096 }
 0x3ee   : > { %p1421_p2 = scmp.ne.s32.totalorder %s1848_s22, %s1420_s14  ;;  %p1425_p7 = scmp.lt.s32.totalorder %s1848_s22, %s1904_s7 }
 0x3ef   : > { %p1426_p6 = scmp.lt.s32.totalorder %s1424_s17, %s1420_s14 }
 0x3f0   : > { %p1422_p4 = pnand %p1421_p2, %p1567_p5 }
 0x3f1   : > { %p1427_p9 = por %p1426_p6, %p1425_p7 }
 0x3f2   : > { %p1423_p13 = pneg %p1422_p4 }
 0x3f4   : > { %p1428_p10 = pnand %p1427_p9, %p1423_p13 }
 0x3f6   : > { %1431 = shalt.err (!%p1428_p10)
}
 0x3f7   : > { %s1488_s21 = smov 256  }
 0x3f8   : > { %1263 = dma.vmem_to_hbm [thread:$0]  (%p1567_p5), %s1851_s19, 2048, %s1848_s22, %s1856_s29, %s1488_s21, %s1488_s21, %s1482_s23  }
 0x3f9 PF: > { %p1280_p12 = scmp.ge.s32.totalorder %s1474_s27, 2  ;;  %s1127_s28 = sand.u32 1, %s1462_s24  }
 0x3fa   : > { %p1916_p8 = scmp.ne.s32.totalorder %s1907_s12, 0  ;;  %s1128_s8 = scalar_lea.sflag [#allocation5], %s1127_s28 }
 0x3fc   : > { %p1273_p11 = pnand %p1280_p12, %p1916_p8 }
 0x3fe   : > { %p1274_p0 = pneg %p1273_p11 }
 0x400   : > { %1457 = dma.done.wait (%p1274_p0), %s1128_s8, 2048  }
 0x401   : > { %1459 = vsyncadd (%p1274_p0), %s1128_s8, 4294965248  ;;  %p19_p1 = scmp.ge.s32.totalorder %s1554_s30, 4   ;;  %s1917_s24 = smov %s1466_s25 }
 0x402   : > { %s1918_s25 = smov %s1470_s26  ;;  %s1919_s26 = smov %s1565_s10 }
 0x403   : > { %s1920_s27 = smov %s1554_s30  ;;  %21 = sbr.rel (!%p19_p1) target bundleno = 5 (0x5), region = 94 }
 0x408   :  { %1133 = vsyncpa [#allocation4], 1 }
 0x409   :  { %1135 = vsyncpa [#allocation4 + $0x1], 1 }
 0x40a   :  { %1136 = vsyncpa [#allocation7], 1 }
 0x40b   :  { %1137 = vsyncpa [#allocation5], 1 }
 0x40c   :  { %1139 = vsyncpa [#allocation5 + $0x1], 1 }

</bundles_post_ra>
